<compile_context>
chip_gen: v7x
topology: tpu7x:2x2x1
jax: 0.10.0
libtpu: 0.0.40
codegen_flags: <defaults>
</compile_context>

<pallas_src>
import functools
import math

import jax
import jax.numpy as jnp
from jax.experimental import pallas as pl
from jax.experimental.pallas import tpu as pltpu


def _round_up(n, m):
    return ((n + m - 1) // m) * m


def _cdiv(a, b):
    return -(-a // b)


def _attn_ctx_kernel(x_ref, w_ref, b_ref, u_ref, o_ref, *,
                     t_real, t_chunk, compute_dtype):
    # x_ref: (Bt, Tp, D) input dtype; w_ref: (D, D) compute dtype
    # b_ref, u_ref: (1, D) f32; o_ref: (Bt, D) output dtype
    bt, tp, d = x_ref.shape
    nc = tp // t_chunk

    w = w_ref[...]            # resident (constant index map)
    bias = b_ref[...]
    u = u_ref[...]
    neg_big = jnp.float32(-1e30)

    def body(c, carry):
        m, l, acc = carry                               # (Bt,1,1) (Bt,1,1) (Bt,1,D)
        t0 = c * t_chunk
        if not isinstance(t0, int):
            t0 = pl.multiple_of(t0, t_chunk)
        xc = x_ref[:, pl.ds(t0, t_chunk), :]            # (Bt, Tk, D) input dtype

        # One fat MXU matmul over the chunk: (Bt*Tk, D) @ (D, D), f32 accumulate.
        # Tk is a multiple of the input-dtype sublane tile, so the reshape is a
        # free relayout; the compute-dtype cast happens here, inside the kernel.
        x2 = xc.reshape(bt * t_chunk, d).astype(compute_dtype)
        uit = jnp.dot(x2, w, preferred_element_type=jnp.float32)
        uit = jnp.tanh(uit + bias)                      # EUP tanh, bias broadcast

        # u-projection: VPU multiply + lane (XLU) reduce — not a degenerate matmul.
        ait = jnp.sum(uit.reshape(bt, t_chunk, d) * u, axis=-1, keepdims=True)

        if t_real < tp:  # mask zero-padded sequence rows (only emitted if padded)
            pos = jax.lax.broadcasted_iota(jnp.int32, (bt, t_chunk, 1), 1) + t0
            ait = jnp.where(pos < t_real, ait, neg_big)

        # Online softmax across sequence chunks.
        m_new = jnp.maximum(m, jnp.max(ait, axis=1, keepdims=True))   # (Bt,1,1)
        alpha = jnp.exp(m - m_new)
        p = jnp.exp(ait - m_new)                                       # (Bt,Tk,1)
        l_new = alpha * l + jnp.sum(p, axis=1, keepdims=True)

        # Weighted x chunk: VPU mul + sublane reduce, f32 accumulation.  x stays
        # in its input dtype (no full-tile f32 copy of the x block).
        if xc.dtype in (jnp.bfloat16, jnp.float16):
            xw = (xc * p.astype(xc.dtype)).astype(jnp.float32)
        else:
            xw = xc.astype(jnp.float32) * p
        acc_new = alpha * acc + jnp.sum(xw, axis=1, keepdims=True)     # (Bt,1,D)
        return m_new, l_new, acc_new

    init = (jnp.full((bt, 1, 1), -jnp.inf, jnp.float32),
            jnp.zeros((bt, 1, 1), jnp.float32),
            jnp.zeros((bt, 1, d), jnp.float32))
    m, l, acc = jax.lax.fori_loop(0, nc, body, init, unroll=nc <= 2)

    inv_l = pl.reciprocal(l, approx=True)   # EUP vrcp; l >= 1 by construction
    o_ref[...] = (acc * inv_l).reshape(bt, d).astype(o_ref.dtype)


def _vmem_limits():
    """Generation-aware (budget_for_tiling, vmem_limit_bytes)."""
    cap = None
    try:
        cap = getattr(pltpu.get_tpu_info(), "vmem_capacity_bytes", None)
    except Exception:
        cap = None
    if not cap:
        cap = 64 * 1024 * 1024   # conservative fallback (v7x per-TensorCore VMEM)
    limit = max(32 * 1024 * 1024, min(cap - 24 * 1024 * 1024, int(cap * 0.80)))
    budget = limit // 2          # headroom for compiler scratch / regalloc spills
    return budget, limit


def _vmem_need_bytes(bt, tp, tk, d, x_isz, cmp_isz, out_isz):
    """Conservative per-grid-step VMEM footprint (counts f32 intermediates)."""
    dl = _round_up(d, 128)
    dr = _round_up(d, 8)
    need = 2 * bt * tp * dl * x_isz                 # double-buffered x input blocks
    need += bt * tk * dl * (8 + cmp_isz + x_isz)    # chunk intermediates: uit/p f32 + casted operand
    need += 2 * dr * dl * cmp_isz                   # W (counted double-buffered)
    need += 2 * _round_up(bt, 8) * dl * out_isz     # double-buffered output blocks
    need += bt * dl * 12                            # online-softmax carries (m, l, acc)
    need += 4 * 8 * dl * 4                          # b, u
    return need


def _choose_block_batch(B, tp, tk, d, x_isz, cmp_isz, out_isz,
                        align_b, max_bt, budget_bytes):
    cap = max(align_b, min((max_bt // align_b) * align_b, _round_up(B, align_b)))
    bt = align_b
    for cand in range(cap, align_b - 1, -align_b):
        waste = _round_up(B, cand) - B
        if cand > align_b and waste > max(align_b, cand // 4):
            continue   # padded batch rows are real HBM reads + real work
        if _vmem_need_bytes(cand, tp, tk, d, x_isz, cmp_isz, out_isz) <= budget_bytes:
            bt = cand
            break
    # Keep >= 4 grid steps when the batch allows it: overlaps next-block DMA with
    # compute and keeps both v7x TensorCores busy on the 'parallel' axis.
    while bt > align_b and _cdiv(B, bt) < 4:
        bt -= align_b
    return bt


def attention_with_context(x, W, b, u, *, compute_dtype=None,
                           max_block_batch=128, t_chunk_target=128):
    """x: (B, T, D); W: (D, D); b: (D,) or None; u: (D,). Returns (B, D) in x.dtype.

    compute_dtype: dtype of the MXU operands (x chunk, W).  bf16 is worthwhile on
    v5e, v6e and v7x alike (the MXU is bf16-native on all three); accumulation
    and the softmax stay f32 regardless, and the final weighted sum always uses
    the un-rounded input x.
    """
    B, T, D = x.shape
    f32 = jnp.float32
    if compute_dtype is None:
        compute_dtype = x.dtype
    compute_dtype = jnp.dtype(compute_dtype)
    if b is None:
        b = jnp.zeros((D,), f32)

    x_isz = jnp.dtype(x.dtype).itemsize
    cmp_isz = compute_dtype.itemsize
    out_isz = x_isz
    align = max(8, 32 // x_isz)     # sublane rows per (8,128) tile for x's dtype

    # Sequence chunking: Tk | Tp, Tk a multiple of the sublane alignment so the
    # in-kernel (Bt, Tk, D) -> (Bt*Tk, D) reshape is a free relayout.
    n_chunks = max(1, _cdiv(T, t_chunk_target))
    Tk = _round_up(_cdiv(T, n_chunks), align)
    Tp = Tk * _cdiv(T, Tk)

    budget, vmem_limit = _vmem_limits()
    Bt = _choose_block_batch(B, Tp, Tk, D, x_isz, cmp_isz, out_isz,
                             align, max_block_batch, budget)
    Bp = _round_up(B, Bt)
    grid_b = Bp // Bt

    # x reaches the kernel unpadded along D always, and along T in the common
    # (T % align == 0) case; only the batch-block remainder and a sub-'align'
    # sequence tail get zero-padded (padded rows are masked / sliced off).
    if Bp != B or Tp != T:
        x_in = jnp.pad(x, ((0, Bp - B), (0, Tp - T), (0, 0)))
    else:
        x_in = x

    W_c = W.astype(compute_dtype)          # tiny; halves resident W for bf16
    b_p = b.astype(f32).reshape(1, D)
    u_p = u.astype(f32).reshape(1, D)

    kernel = functools.partial(_attn_ctx_kernel, t_real=T, t_chunk=Tk,
                               compute_dtype=compute_dtype)

    out = pl.pallas_call(
        kernel,
        out_shape=jax.ShapeDtypeStruct((Bp, D), x.dtype),
        grid_spec=pltpu.PrefetchScalarGridSpec(
            num_scalar_prefetch=0,
            grid=(grid_b,),
            in_specs=[
                # Full-extent T/D block on x: block dims equal the array dims, so
                # no (8,128) padding of x is required and HBM reads stay 1:1.
                pl.BlockSpec((Bt, Tp, D), lambda i: (i, 0, 0)),
                pl.BlockSpec((D, D), lambda i: (0, 0)),     # W: resident
                pl.BlockSpec((1, D), lambda i: (0, 0)),     # b (f32)
                pl.BlockSpec((1, D), lambda i: (0, 0)),     # u (f32)
            ],
            out_specs=pl.BlockSpec((Bt, D), lambda i: (i, 0)),
        ),
        compiler_params=pltpu.CompilerParams(
            dimension_semantics=("parallel",),
            vmem_limit_bytes=vmem_limit,
        ),
    )(x_in, W_c, b_p, u_p)

    return out[:B] if Bp != B else out


def _reference(x, W, b, u):
    uit = jnp.tanh(jnp.matmul(x, W) + b)
    ait = jnp.matmul(uit, u)                      # (B, T)
    a = jax.nn.softmax(ait, axis=1)[..., None]    # (B, T, 1)
    return jnp.sum(x * a, axis=1)                 # (B, D)


if __name__ == "__main__":
    B, T, D = 2, 8, 32

    key = jax.random.PRNGKey(0)
    kx, kw, ku = jax.random.split(key, 3)

    # Deterministic parameter init matching the PyTorch module's __init__:
    #  W: xavier_uniform with tanh gain (5/3); b: zeros; u: uniform(-0.1527, 0.1527)
    gain = 5.0 / 3.0
    bound_w = gain * math.sqrt(6.0 / (D + D))
    W = jax.random.uniform(kw, (D, D), jnp.float32, minval=-bound_w, maxval=bound_w)
    b = jnp.zeros((D,), jnp.float32)
    u = jax.random.uniform(ku, (D,), jnp.float32, minval=-0.1527, maxval=0.1527)

    x = jax.random.normal(kx, (B, T, D), jnp.float32)

    ref = _reference(x, W, b, u)

    # f32 compute path (tolerance loosened slightly for the EUP approx reciprocal).
    out = attention_with_context(x, W, b, u)
    out = jax.block_until_ready(out)
    assert out.shape == (B, D)
    assert jnp.allclose(out, ref, atol=2e-3, rtol=2e-3), "f32 path mismatch vs reference"

    # bf16 MXU-operand path (worthwhile on v5e/v6e/v7x); accumulation stays f32.
    out_bf16 = attention_with_context(x, W, b, u, compute_dtype=jnp.bfloat16)
    out_bf16 = jax.block_until_ready(out_bf16)
    assert out_bf16.shape == (B, D)
    assert jnp.allclose(out_bf16, ref, atol=5e-2, rtol=5e-2), "bf16 path mismatch vs reference"

    print("KERNEL_OK")
</pallas_src>

<mosaic_0001>
module attributes {stable_mosaic.version = 11 : i64} {
  func.func @_attn_ctx_kernel(%arg0: i32, %arg1: memref<8x8x32xf32, #tpu.memory_space<vmem>>, %arg2: memref<32x32xf32, #tpu.memory_space<vmem>>, %arg3: memref<1x32xf32, #tpu.memory_space<vmem>>, %arg4: memref<1x32xf32, #tpu.memory_space<vmem>>, %arg5: memref<8x32xf32, #tpu.memory_space<vmem>>) attributes {dimension_semantics = [#tpu.dimension_semantics<parallel>], iteration_bounds = array<i64: 1>, scalar_prefetch = 0 : i64, scratch_operands = 0 : i64, tpu.core_type = #tpu.core_type<tc>, window_params = [{transform_indices = @transform_0, window_bounds = array<i64: 8, 8, 32>}, {pipeline_mode = #tpu.pipeline_mode<synchronous>, transform_indices = @transform_1, window_bounds = array<i64: 32, 32>}, {pipeline_mode = #tpu.pipeline_mode<synchronous>, transform_indices = @transform_2, window_bounds = array<i64: 1, 32>}, {pipeline_mode = #tpu.pipeline_mode<synchronous>, transform_indices = @transform_3, window_bounds = array<i64: 1, 32>}, {transform_indices = @transform_4, window_bounds = array<i64: 8, 32>}]} {
    %c0 = arith.constant 0 : index
    %c0_0 = arith.constant 0 : index
    %0 = vector.load %arg2[%c0, %c0_0] : memref<32x32xf32, #tpu.memory_space<vmem>>, vector<32x32xf32>
    %c0_1 = arith.constant 0 : index
    %c0_2 = arith.constant 0 : index
    %1 = vector.load %arg3[%c0_1, %c0_2] : memref<1x32xf32, #tpu.memory_space<vmem>>, vector<1x32xf32>
    %c0_3 = arith.constant 0 : index
    %c0_4 = arith.constant 0 : index
    %2 = vector.load %arg4[%c0_3, %c0_4] : memref<1x32xf32, #tpu.memory_space<vmem>>, vector<1x32xf32>
    %cst = arith.constant 0xFF800000 : f32
    %3 = vector.broadcast %cst : f32 to vector<8x1x1xf32>
    %cst_5 = arith.constant 0.000000e+00 : f32
    %4 = vector.broadcast %cst_5 : f32 to vector<8x1x1xf32>
    %cst_6 = arith.constant 0.000000e+00 : f32
    %5 = vector.broadcast %cst_6 : f32 to vector<8x1x32xf32>
    %c0_i32 = arith.constant 0 : i32
    %c8_i32 = arith.constant 8 : i32
    %6 = arith.muli %c0_i32, %c8_i32 : i32
    %7 = tpu.assume_multiple %6, 8 : i32
    %c0_7 = arith.constant 0 : index
    %8 = arith.index_cast %7 : i32 to index
    %c0_8 = arith.constant 0 : index
    %9 = vector.load %arg1[%c0_7, %8, %c0_8] : memref<8x8x32xf32, #tpu.memory_space<vmem>>, vector<8x8x32xf32>
    %10 = vector.shape_cast %9 : vector<8x8x32xf32> to vector<64x32xf32>
    %cst_9 = arith.constant dense<0.000000e+00> : vector<64x32xf32>
    %11 = tpu.matmul %10, %0, %cst_9 {dimension_numbers = #tpu.dot_dimension_numbers<[1], [0], [0], [1], [0, 0, 1, 1], [], []>} : vector<64x32xf32>, vector<32x32xf32>, vector<64x32xf32> -> vector<64x32xf32>
    %12 = vector.broadcast %1 : vector<1x32xf32> to vector<64x32xf32>
    %13 = arith.addf %11, %12 : vector<64x32xf32>
    %14 = math.tanh %13 : vector<64x32xf32>
    %15 = vector.shape_cast %14 : vector<64x32xf32> to vector<8x8x32xf32>
    %16 = vector.shape_cast %2 : vector<1x32xf32> to vector<1x1x32xf32>
    %17 = vector.broadcast %16 : vector<1x1x32xf32> to vector<8x8x32xf32>
    %18 = arith.mulf %15, %17 : vector<8x8x32xf32>
    %cst_10 = arith.constant dense<0.000000e+00> : vector<8x8xf32>
    %19 = vector.multi_reduction <add>, %18, %cst_10 [2] : vector<8x8x32xf32> to vector<8x8xf32>
    %20 = vector.shape_cast %19 : vector<8x8xf32> to vector<8x8x1xf32>
    %cst_11 = arith.constant dense<0xFF800000> : vector<8x1xf32>
    %21 = vector.multi_reduction <maximumf>, %20, %cst_11 [1] : vector<8x8x1xf32> to vector<8x1xf32>
    %22 = vector.shape_cast %21 : vector<8x1xf32> to vector<8x1x1xf32>
    %23 = arith.maximumf %3, %22 : vector<8x1x1xf32>
    %24 = arith.subf %3, %23 : vector<8x1x1xf32>
    %25 = math.exp %24 : vector<8x1x1xf32>
    %26 = vector.broadcast %23 : vector<8x1x1xf32> to vector<8x8x1xf32>
    %27 = arith.subf %20, %26 : vector<8x8x1xf32>
    %28 = math.exp %27 : vector<8x8x1xf32>
    %29 = arith.mulf %25, %4 : vector<8x1x1xf32>
    %cst_12 = arith.constant dense<0.000000e+00> : vector<8x1xf32>
    %30 = vector.multi_reduction <add>, %28, %cst_12 [1] : vector<8x8x1xf32> to vector<8x1xf32>
    %31 = vector.shape_cast %30 : vector<8x1xf32> to vector<8x1x1xf32>
    %32 = arith.addf %29, %31 : vector<8x1x1xf32>
    %33 = vector.broadcast %28 : vector<8x8x1xf32> to vector<8x8x32xf32>
    %34 = arith.mulf %9, %33 : vector<8x8x32xf32>
    %35 = vector.broadcast %25 : vector<8x1x1xf32> to vector<8x1x32xf32>
    %36 = arith.mulf %35, %5 : vector<8x1x32xf32>
    %cst_13 = arith.constant dense<0.000000e+00> : vector<8x32xf32>
    %37 = vector.multi_reduction <add>, %34, %cst_13 [1] : vector<8x8x32xf32> to vector<8x32xf32>
    %38 = vector.shape_cast %37 : vector<8x32xf32> to vector<8x1x32xf32>
    %39 = arith.addf %36, %38 : vector<8x1x32xf32>
    %c1_i32 = arith.constant 1 : i32
    %40 = tpu.reciprocal %32 {approx = true} : vector<8x1x1xf32> -> vector<8x1x1xf32>
    %41 = vector.broadcast %40 : vector<8x1x1xf32> to vector<8x1x32xf32>
    %42 = arith.mulf %39, %41 : vector<8x1x32xf32>
    %43 = vector.shape_cast %42 : vector<8x1x32xf32> to vector<8x32xf32>
    %c0_14 = arith.constant 0 : index
    %c0_15 = arith.constant 0 : index
    %44 = vector.load %arg5[%c0_14, %c0_15] : memref<8x32xf32, #tpu.memory_space<vmem>>, vector<8x32xf32>
    tpu.vector_store %arg5[%c0_14, %c0_15], %43 {strides = array<i32>} : memref<8x32xf32, #tpu.memory_space<vmem>>, vector<8x32xf32>,
    return
  }
  func.func @transform_0(%arg0: i32) -> (i32, i32, i32) {
    %c0_i32 = arith.constant 0 : i32
    %c0_i32_0 = arith.constant 0 : i32
    %c0_i32_1 = arith.constant 0 : i32
    return %arg0, %c0_i32, %c0_i32_0 : i32, i32, i32
  }
  func.func @transform_1(%arg0: i32) -> (i32, i32) {
    %c0_i32 = arith.constant 0 : i32
    %c0_i32_0 = arith.constant 0 : i32
    %c0_i32_1 = arith.constant 0 : i32
    return %c0_i32, %c0_i32_0 : i32, i32
  }
  func.func @transform_2(%arg0: i32) -> (i32, i32) {
    %c0_i32 = arith.constant 0 : i32
    %c0_i32_0 = arith.constant 0 : i32
    %c0_i32_1 = arith.constant 0 : i32
    return %c0_i32, %c0_i32_0 : i32, i32
  }
  func.func @transform_3(%arg0: i32) -> (i32, i32) {
    %c0_i32 = arith.constant 0 : i32
    %c0_i32_0 = arith.constant 0 : i32
    %c0_i32_1 = arith.constant 0 : i32
    return %c0_i32, %c0_i32_0 : i32, i32
  }
  func.func @transform_4(%arg0: i32) -> (i32, i32) {
    %c0_i32 = arith.constant 0 : i32
    %c0_i32_0 = arith.constant 0 : i32
    return %arg0, %c0_i32 : i32, i32
  }
}

</mosaic_0001>

<bundles_post_ra>
// kernel: tpu_custom_call.1
= control target key start
LH: loop header
LB: loop body
LE: loop exit
PB: predicated region body
PF: predicated region fallthrough
CT: control target
= control target key end

     0   :  { %9 = vsyncpa [#allocation3], 0  ;;  %s892_s0 = inlined_call_operand.hbm [shape: f32[8,8,32], index: 0, kind: input, shape index: {}]   ;;  %s893_s1 = inlined_call_operand.hbm [shape: f32[32,32], index: 1, kind: input, shape index: {}]   ;;  %s894_s2 = inlined_call_operand.vmem [shape: f32[1,32], index: 2, kind: input, shape index: {}]   ;;  %s895_s3 = inlined_call_operand.vmem [shape: f32[1,32], index: 3, kind: input, shape index: {}]   ;;  %s896_s4 = inlined_call_operand.hbm [shape: f32[8,32], index: 4, kind: output, shape index: {}]  }
   0x1   :  { %10 = vsyncpa [#allocation6], 0 }
   0x2   :  { %11 = vsyncpa [#allocation4], 0  ;;  %s725_s15 = smov [#allocation2]   ;;  %s653_s19 = scalar_lea.hbm %s892_s0, 1024 }
   0x3   :  { %s17_s16 = sshll.u32 %s725_s15, 4  ;;  %p654_p0 = scmp.ne.s32.totalorder %s892_s0, %s653_s19  ;;  %s18_s16 = int_to_ptr.vmem [resolvable:$true] %s17_s16 }
   0x4   :  { %p657_p1 = scmp.lt.u32.totalorder %s653_s19, %s892_s0 }
   0x6   :  { %p659_p2 = pnand %p657_p1, %p654_p0 }
   0x8   :  { %662 = shalt.err (!%p659_p2)
}
   0x9   :  { %s663_s24 = scalar_lea.vmem %s18_s16, 1024  ;;  %p668_p4 = scmp.lt.s32.totalorder %s18_s16, %s18_s16 }
   0xa   :  { %p664_p3 = scmp.ne.s32.totalorder %s18_s16, %s663_s24  ;;  %p669_p5 = scmp.lt.s32.totalorder %s663_s24, %s663_s24 }
   0xc   :  { %p670_p6 = por %p669_p5, %p668_p4 }
   0xe   :  { %p671_p7 = pnand %p670_p6, %p664_p3 }
  0x10   :  { %674 = shalt.err (!%p671_p7)
}
  0x11   :  { %s726_s25 = smov 128   ;;  %s727_s26 = smov 8  }
  0x12   :  { %23 = dma.hbm_to_vmem [thread:$0]  %s892_s0, 1024, %s18_s16, [#allocation3], %s726_s25, %s726_s25, %s727_s26  }
  0x13   :  { %s728_s29 = smov [#allocation5]   ;;  %s675_s7 = scalar_lea.hbm %s893_s1, 512 }
  0x14   :  { %s29_s30 = sshll.u32 %s728_s29, 4  ;;  %p676_p8 = scmp.ne.s32.totalorder %s893_s1, %s675_s7  ;;  %s30_s30 = int_to_ptr.vmem [resolvable:$true] %s29_s30 }
  0x15   :  { %p679_p9 = scmp.lt.u32.totalorder %s675_s7, %s893_s1 }
  0x17   :  { %p681_p10 = pnand %p679_p9, %p676_p8 }
  0x19   :  { %684 = shalt.err (!%p681_p10)
}
  0x1a   :  { %s685_s12 = scalar_lea.vmem %s30_s30, 512  ;;  %p690_p12 = scmp.lt.s32.totalorder %s30_s30, %s30_s30 }
  0x1b   :  { %p686_p11 = scmp.ne.s32.totalorder %s30_s30, %s685_s12  ;;  %p691_p13 = scmp.lt.s32.totalorder %s685_s12, %s685_s12 }
  0x1d   :  { %p692_p0 = por %p691_p13, %p690_p12 }
  0x1f   :  { %p693_p1 = pnand %p692_p0, %p686_p11 }
  0x21   :  { %696 = shalt.err (!%p693_p1)
}
  0x22   :  { %35 = dma.hbm_to_vmem [thread:$0]  %s893_s1, 512, %s30_s30, [#allocation6], %s726_s25, %s726_s25, %s727_s26  }
  0x23   :  { %719 = dma.done.wait [#allocation3], 1024  }
  0x24   :  { %720 = vsyncadd [#allocation3], 4294966272 }
  0x25   :  { %721 = dma.done.wait [#allocation6], 512  }
  0x26   :  { %722 = vsyncadd [#allocation6], 4294966784  ;;  %vm66_vm0 = vcmask 261120   ;;  %v46_v0 = vld [vmem:[#allocation5] sm:$0xff]  ;;  %v47_v1 = vld [vmem:[#allocation5 + $0x8] sm:$0xff]  ;;  %vm498_vm1 = vcmask 1041409  }
  0x27   :  { %v48_v2 = vld [vmem:[#allocation5 + $0x10] sm:$0xff]  ;;  %v572_v3 = vpack.c.bf16 %v47_v1, %v46_v0  ;;  %v49_v4 = vld [vmem:[#allocation5 + $0x18] sm:$0xff]  ;;  %v779_v5 = vld [vmem:[#allocation2] sm:$0xff]  ;;  %vm500_vm2 = vcmask 1042434   ;;  %vm502_vm3 = vcmask 1043459   ;;  %vm504_vm4 = vcmask 1044484  }
  0x28   :  { %v576_v6 = vpack.c.bf16 %v49_v4, %v48_v2  ;;  %560 = vmatprep.mubr.msk.f32.mxu0 %vm66_vm0, %v779_v5  ;;  %v783_v7 = vld [vmem:[#allocation2 + $0x20] sm:$0xff]  ;;  %v787_v8 = vld [vmem:[#allocation2 + $0x8] sm:$0xff]  ;;  %v791_v10 = vld [vmem:[#allocation2 + $0x10] sm:$0xff]  ;;  %vm506_vm5 = vcmask 1045509   ;;  %vm508_vm6 = vcmask 1046534   ;;  %vm510_vm7 = vcmask 1047559  }
  0x29   :  { %573 = vmatprep.subr.bf16.mxu0 %v572_v3  ;;  %580 = vmatprep.subr.bf16.mxu1 %v572_v3  ;;  %v789_v9 = vld [vmem:[#allocation2 + $0x28] sm:$0xff]  ;;  %v793_v11 = vld [vmem:[#allocation2 + $0x30] sm:$0xff]  ;;  %v801_v12 = vld [vmem:[#allocation2 + $0x18] sm:$0xff] }
  0x2a   :  { %575 = vmatpush3.bf16.msra.mxu0 %v572_v3  ;;  %582 = vmatpush3.bf16.msra.mxu1 %v572_v3  ;;  %v805_v13 = vld [vmem:[#allocation2 + $0x38] sm:$0xff]  ;;  %v530_v14 = vld [vmem:[%s894_s2] ss:$0 sm:$0xff] }
  0x2b   :  { %577 = vmatprep.subr.bf16.mxu0 %v576_v6  ;;  %581 = vmatprep.subr.bf16.mxu1 %v576_v6  ;;  %v539_v31 = vld [vmem:[%s895_s3] ss:$0 sm:$0xff]  ;;  %s729_s3 = smov [#allocation7]  }
  0x2c   :  { %566 = vmatprep.mubr.msk.f32.mxu1 %vm66_vm0, %v783_v7  ;;  %s520_s16 = sshll.u32 %s729_s3, 4  ;;  %s521_s16 = int_to_ptr.vmem [resolvable:$true] %s520_s16 }
  0x2d   :  { %s697_s17 = scalar_lea.vmem %s521_s16, 128  ;;  %p702_p3 = scmp.lt.s32.totalorder %s521_s16, %s521_s16 }
  0x2e   :  { %579 = vmatpush3.bf16.msra.mxu0 %v576_v6  ;;  %583 = vmatpush3.bf16.msra.mxu1 %v576_v6  ;;  %p698_p2 = scmp.ne.s32.totalorder %s521_s16, %s697_s17  ;;  %p703_p4 = scmp.lt.s32.totalorder %s697_s17, %s697_s17 }
  0x30   :  { %p704_p5 = por %p703_p4, %p702_p3 }
  0x31   :  { %561 = vmatmul.mubr.msk.f32.vlgmr.msra.gmra.mrb[0].mxu0 %vm66_vm0, %v787_v8  ;;  %567 = vmatmul.mubr.msk.f32.vlgmr.msra.gmra.mrb[0].mxu1 %vm66_vm0, %v789_v9 }
  0x32   :  { %563 = vmatprep.mubr.msk.f32.mxu0 %vm66_vm0, %v791_v10  ;;  %569 = vmatprep.mubr.msk.f32.mxu1 %vm66_vm0, %v793_v11  ;;  %p705_p6 = pnand %p704_p5, %p698_p2 }
  0x35   :  { %564 = vmatmul.mubr.msk.f32.gmra.mrb[2].mxu0 %vm66_vm0, %v801_v12  ;;  %570 = vmatmul.mubr.msk.f32.gmra.mrb[2].mxu1 %vm66_vm0, %v805_v13 }
 0x104   :  { %v562_v15 = vpop.f32.mrb[0].mxu0  ;;  %v568_v16 = vpop.f32.mrb[0].mxu1 }
 0x105   :  { %v163_v17 = vadd.f32 %v562_v15, %v530_v14  ;;  %v157_v18 = vpop.f32.mrb[1].mxu0  ;;  %v177_v19 = vpop.f32.mrb[1].mxu1  ;;  %v183_v29 = vadd.f32 %v568_v16, %v530_v14 }
 0x106   :  { %v158_v20 = vadd.f32 %v530_v14, %v157_v18  ;;  %v178_v21 = vadd.f32 %v530_v14, %v177_v19 }
 0x107   :  { %589 = vtanh.f32 %v163_v17 }
 0x108   :  { %591 = vtanh.f32 %v158_v20  ;;  %v565_v22 = vpop.f32.mrb[2].mxu0  ;;  %v571_v23 = vpop.f32.mrb[2].mxu1 }
 0x109   :  { %v173_v24 = vadd.f32 %v565_v22, %v530_v14  ;;  %v167_v25 = vpop.f32.mrb[3].mxu0  ;;  %v187_v26 = vpop.f32.mrb[3].mxu1  ;;  %593 = vtanh.f32 %v178_v21  ;;  %v193_v30 = vadd.f32 %v571_v23, %v530_v14 }
 0x10a   :  { %v168_v27 = vadd.f32 %v530_v14, %v167_v25  ;;  %v188_v28 = vadd.f32 %v530_v14, %v187_v26 }
 0x10b   :  { %595 = vtanh.f32 %v173_v24 }
 0x10c   :  { %597 = vtanh.f32 %v168_v27 }
 0x10d   :  { %599 = vtanh.f32 %v188_v28 }
 0x10e   :  { %601 = vtanh.f32 %v183_v29 }
 0x10f   :  { %603 = vtanh.f32 %v193_v30 }
 0x111   :  { %v590_v32 = vpop.eup %589 }
 0x112   :  { %v592_v33 = vpop.eup %591  ;;  %v211_v34 = vmul.f32 %v590_v32, %v539_v31 }
 0x113   :  { %v594_v35 = vpop.eup %593  ;;  %v210_v37 = vmul.f32 %v592_v33, %v539_v31 }
 0x114   :  { %v221_v36 = vsel %vm66_vm0, %v211_v34, 0.0  ;;  %v214_v41 = vmul.f32 %v594_v35, %v539_v31 }
 0x115   :  { %v596_v38 = vpop.eup %595  ;;  %222 = vadd.xlane.f32.xlu0 %v221_v36  ;;  %v218_v44 = vsel %vm66_vm0, %v210_v37, 0.0 }
 0x116   :  { %v598_v39 = vpop.eup %597  ;;  %v213_v40 = vmul.f32 %v596_v38, %v539_v31  ;;  %v230_v47 = vsel %vm66_vm0, %v214_v41, 0.0 }
 0x117   :  { %v600_v42 = vpop.eup %599  ;;  %v212_v45 = vmul.f32 %v598_v39, %v539_v31 }
 0x118   :  { %v227_v43 = vsel %vm66_vm0, %v213_v40, 0.0  ;;  %v602_v46 = vpop.eup %601  ;;  %v216_v48 = vmul.f32 %v600_v42, %v539_v31 }
 0x119   :  { %228 = vadd.xlane.f32.xlu1 %v227_v43  ;;  %219 = vadd.xlane.f32.xlu0 %v218_v44  ;;  %v224_v49 = vsel %vm66_vm0, %v212_v45, 0.0  ;;  %v215_v50 = vmul.f32 %v602_v46, %v539_v31  ;;  %v604_v51 = vpop.eup %603 }
 0x11a   :  { %v236_v52 = vsel %vm66_vm0, %v216_v48, 0.0  ;;  %v217_v54 = vmul.f32 %v604_v51, %v539_v31 }
 0x11b   :  { %v233_v53 = vsel %vm66_vm0, %v215_v50, 0.0 }
 0x11c   :  { %v239_v55 = vsel %vm66_vm0, %v217_v54, 0.0 }
 0x11d   :  { %225 = vadd.xlane.f32.xlu1 %v224_v49  ;;  %231 = vadd.xlane.f32.xlu0 %v230_v47 }
 0x121   :  { %234 = vadd.xlane.f32.xlu1 %v233_v53  ;;  %237 = vadd.xlane.f32.xlu0 %v236_v52 }
 0x125   :  { %240 = vadd.xlane.f32.xlu1 %v239_v55 }
 0x1a2   :  { %v223_v56 = vpop.xlane.xlu0 %222 }
 0x1a3   :  { %v248_v57 = vrot.slane %v223_v56, 4 }
 0x1a5   :  { %v249_v58 = vmax.f32 %v223_v56, %v248_v57 }
 0x1a6   :  { %v229_v59 = vpop.xlane.xlu1 %228  ;;  %v220_v60 = vpop.xlane.xlu0 %219 }
 0x1a7   :  { %v250_v61 = vrot.slane %v249_v58, 2  ;;  %v260_v62 = vrot.slane %v229_v59, 4  ;;  %v242_v63 = vrot.slane %v220_v60, 4 }
 0x1a9   :  { %v261_v0 = vmax.f32 %v229_v59, %v260_v62  ;;  %v243_v1 = vmax.f32 %v220_v60, %v242_v63  ;;  %v251_v4 = vmax.f32 %v249_v58, %v250_v61 }
 0x1aa   :  { %v226_v2 = vpop.xlane.xlu1 %225  ;;  %v232_v3 = vpop.xlane.xlu0 %231 }
 0x1ab   :  { %v244_v6 = vrot.slane %v243_v1, 2  ;;  %v254_v14 = vrot.slane %v226_v2, 4  ;;  %v262_v15 = vrot.slane %v261_v0, 2  ;;  %v266_v16 = vrot.slane %v232_v3, 4 }
 0x1ac   :  { %v252_v21 = vrot.slane %v251_v4, 1 }
 0x1ad   :  { %v245_v17 = vmax.f32 %v243_v1, %v244_v6  ;;  %v255_v18 = vmax.f32 %v226_v2, %v254_v14  ;;  %v267_v19 = vmax.f32 %v232_v3, %v266_v16  ;;  %v263_v23 = vmax.f32 %v261_v0, %v262_v15 }
 0x1ae   :  { %v235_v20 = vpop.xlane.xlu1 %234  ;;  %v825_v31 = vpop.xlane.xlu0 %237  ;;  %v253_v32 = vmax.f32 %v251_v4, %v252_v21 }
 0x1af   :  { %v246_v22 = vrot.slane %v245_v17, 1  ;;  %v256_v24 = vrot.slane %v255_v18, 2  ;;  %v268_v25 = vrot.slane %v267_v19, 2  ;;  %v272_v26 = vrot.slane %v235_v20, 4 }
 0x1b0   :  { %v264_v33 = vrot.slane %v263_v23, 1  ;;  %v278_v36 = vrot.slane %v825_v31, 4  ;;  %v315_v40 = vsub.f32 %v223_v56, %v253_v32  ;;  %v291_v54 = vsub.f32 -inf, %v253_v32 }
 0x1b1   :  { %v247_v27 = vmax.f32 %v245_v17, %v246_v22  ;;  %v257_v28 = vmax.f32 %v255_v18, %v256_v24  ;;  %v269_v29 = vmax.f32 %v267_v19, %v268_v25  ;;  %v273_v30 = vmax.f32 %v235_v20, %v272_v26 }
 0x1b2   :  { %v265_v41 = vmax.f32 %v263_v23, %v264_v33  ;;  %v279_v45 = vmax.f32 %v825_v31, %v278_v36  ;;  %v324_v48 = vmul.f32 1.442695, %v315_v40  ;;  %v832_v63 = vpop.xlane.xlu1 %240 }
 0x1b3   :  { %v258_v34 = vrot.slane %v257_v28, 1  ;;  %v314_v35 = vsub.f32 %v220_v60, %v247_v27  ;;  %v270_v38 = vrot.slane %v269_v29, 1  ;;  %v274_v39 = vrot.slane %v273_v30, 2 }
 0x1b4   :  { %v317_v50 = vsub.f32 %v229_v59, %v265_v41  ;;  %v280_v52 = vrot.slane %v279_v45, 2  ;;  %v300_v60 = vmul.f32 1.442695, %v291_v54  ;;  %v293_v61 = vsub.f32 -inf, %v265_v41 }
 0x1b5   :  { %v259_v37 = vmax.f32 %v257_v28, %v258_v34  ;;  %v322_v43 = vmul.f32 1.442695, %v314_v35  ;;  %v275_v44 = vmax.f32 %v273_v30, %v274_v39  ;;  %v271_v47 = vmax.f32 %v269_v29, %v270_v38 }
 0x1b6   :  { %v328_v55 = vmul.f32 1.442695, %v317_v50  ;;  %v281_v57 = vmax.f32 %v279_v45, %v280_v52  ;;  %v304_v1 = vmul.f32 1.442695, %v293_v61 }
 0x1b7   :  { %v316_v42 = vsub.f32 %v226_v2, %v259_v37  ;;  %v276_v49 = vrot.slane %v275_v44, 1  ;;  %605 = vpow2.f32 %v322_v43  ;;  %v318_v53 = vsub.f32 %v232_v3, %v271_v47 }
 0x1b8   :  { %v282_v59 = vrot.slane %v281_v57, 1  ;;  %v290_v2 = vsub.f32 -inf, %v247_v27  ;;  %v284_v3 = vrot.slane %v832_v63, 4  ;;  %v292_v6 = vsub.f32 -inf, %v259_v37 }
 0x1b9   :  { %v326_v46 = vmul.f32 1.442695, %v316_v42  ;;  %v829_v51 = vmax.f32 %v275_v44, %v276_v49  ;;  %v330_v58 = vmul.f32 1.442695, %v318_v53  ;;  %v294_v26 = vsub.f32 -inf, %v271_v47 }
 0x1ba   :  { %v283_v15 = vmax.f32 %v281_v57, %v282_v59  ;;  %v298_v17 = vmul.f32 1.442695, %v290_v2  ;;  %v285_v19 = vmax.f32 %v832_v63, %v284_v3  ;;  %v302_v21 = vmul.f32 1.442695, %v292_v6 }
 0x1bb   :  { %607 = vpow2.f32 %v326_v46  ;;  %v319_v56 = vsub.f32 %v235_v20, %v829_v51  ;;  %v295_v35 = vsub.f32 -inf, %v829_v51  ;;  %v306_v39 = vmul.f32 1.442695, %v294_v26 }
 0x1bc   :  { %609 = vpow2.f32 %v324_v48  ;;  %v320_v23 = vsub.f32 %v825_v31, %v283_v15  ;;  %v286_v28 = vrot.slane %v285_v19, 2  ;;  %v296_v47 = vsub.f32 -inf, %v283_v15 }
 0x1bd   :  { %611 = vpow2.f32 %v328_v55  ;;  %v332_v62 = vmul.f32 1.442695, %v319_v56  ;;  %v308_v50 = vmul.f32 1.442695, %v295_v35 }
 0x1be   :  { %613 = vpow2.f32 %v330_v58  ;;  %v334_v36 = vmul.f32 1.442695, %v320_v23  ;;  %v287_v43 = vmax.f32 %v285_v19, %v286_v28 }
 0x1bf   :  { %615 = vpow2.f32 %v300_v60  ;;  %v310_v60 = vmul.f32 1.442695, %v296_v47 }
 0x1c0   :  { %617 = vpow2.f32 %v332_v62  ;;  %v288_v55 = vrot.slane %v287_v43, 1 }
 0x1c1   :  { %v606_v0 = vpop.eup %605  ;;  %619 = vpow2.f32 %v304_v1 }
 0x1c2   :  { %v346_v16 = vrot.slane %v606_v0, 4  ;;  %621 = vpow2.f32 %v298_v17  ;;  %v402_v38 = vmul.f32 %v606_v0, %v779_v5 }
 0x1c3   :  { %623 = vpow2.f32 %v302_v21 }
 0x1c4   :  { %v347_v25 = vadd.f32 %v606_v0, %v346_v16  ;;  %625 = vpow2.f32 %v334_v36  ;;  %v410_v5 = vsel %vm66_vm0, %v402_v38, 0.0  ;;  %v289_v0 = vmax.f32 %v287_v43, %v288_v55 }
 0x1c5   :  { %v608_v4 = vpop.eup %607  ;;  %627 = vpow2.f32 %v306_v39 }
 0x1c6   :  { %v610_v14 = vpop.eup %609  ;;  %v358_v18 = vrot.slane %v608_v4, 4  ;;  %v348_v31 = vrot.slane %v347_v25, 2  ;;  %v404_v41 = vmul.f32 %v608_v4, %v791_v10  ;;  %629 = vpow2.f32 %v308_v50 }
 0x1c7   :  { %v352_v20 = vrot.slane %v610_v14, 4  ;;  %v403_v22 = vmul.f32 %v610_v14, %v787_v8  ;;  %v612_v24 = vpop.eup %611  ;;  %v321_v17 = vsub.f32 %v832_v63, %v289_v0  ;;  %631 = vpow2.f32 %v310_v60 }
 0x1c8   :  { %v359_v27 = vadd.f32 %v608_v4, %v358_v18  ;;  %v614_v29 = vpop.eup %613  ;;  %v364_v34 = vrot.slane %v612_v24, 4  ;;  %v405_v8 = vmul.f32 %v612_v24, %v801_v12  ;;  %v349_v52 = vadd.f32 %v348_v31, %v347_v25 }
 0x1c9   :  { %v353_v30 = vadd.f32 %v610_v14, %v352_v20  ;;  %v616_v32 = vpop.eup %615  ;;  %v417_v33 = vsel %vm66_vm0, %v403_v22, 0.0  ;;  %v370_v42 = vrot.slane %v614_v29, 4  ;;  %v424_v10 = vsel %vm66_vm0, %v404_v41, 0.0 }
 0x1ca   :  { %v618_v37 = vpop.eup %617  ;;  %v360_v40 = vrot.slane %v359_v27, 2  ;;  %v843_v44 = vmul.f32 0.0, %v616_v32  ;;  %v418_v46 = vrot.slane %v417_v33, 4  ;;  %v365_v49 = vadd.f32 %v612_v24, %v364_v34 }
 0x1cb   :  { %v354_v45 = vrot.slane %v353_v30, 2  ;;  %v620_v48 = vpop.eup %619  ;;  %v376_v51 = vrot.slane %v618_v37, 4  ;;  %v431_v12 = vsel %vm66_vm0, %v405_v8, 0.0  ;;  %v371_v54 = vadd.f32 %v614_v29, %v370_v42 }
 0x1cc   :  { %v361_v53 = vadd.f32 %v360_v40, %v359_v27  ;;  %v419_v57 = vadd.f32 %v418_v46, %v417_v33  ;;  %v848_v58 = vmul.f32 0.0, %v620_v48  ;;  %v622_v61 = vpop.eup %621  ;;  %v366_v62 = vrot.slane %v365_v49, 2 }
 0x1cd   :  { %v355_v56 = vadd.f32 %v354_v45, %v353_v30  ;;  %v377_v59 = vadd.f32 %v618_v37, %v376_v51  ;;  %v624_v1 = vpop.eup %623  ;;  %v432_v2 = vrot.slane %v431_v12, 4  ;;  %v350_v3 = vrot.slane %v349_v52, 1 }
 0x1ce   :  { %v411_v4 = vrot.slane %v410_v5, 4  ;;  %v425_v6 = vrot.slane %v424_v10, 4  ;;  %v362_v14 = vrot.slane %v361_v53, 1  ;;  %v372_v15 = vrot.slane %v371_v54, 2  ;;  %v626_v30 = vpop.eup %625 }
 0x1cf   :  { %v406_v16 = vmul.f32 %v614_v29, %v783_v7  ;;  %v356_v18 = vrot.slane %v355_v56, 1  ;;  %v420_v19 = vrot.slane %v419_v57, 2  ;;  %v852_v20 = vmul.f32 0.0, %v622_v61  ;;  %v628_v33 = vpop.eup %627 }
 0x1d0   :  { %v367_v21 = vadd.f32 %v366_v62, %v365_v49  ;;  %v378_v22 = vrot.slane %v377_v59, 2  ;;  %v407_v23 = vmul.f32 %v618_v37, %v789_v9  ;;  %v336_v24 = vmul.f32 1.442695, %v321_v17  ;;  %v630_v42 = vpop.eup %629 }
 0x1d1   :  { %v351_v25 = vadd.f32 %v350_v3, %v349_v52  ;;  %v412_v26 = vadd.f32 %v411_v4, %v410_v5  ;;  %v855_v27 = vmul.f32 0.0, %v624_v1  ;;  %v426_v28 = vadd.f32 %v425_v6, %v424_v10 }
 0x1d2   :  { %v433_v32 = vadd.f32 %v432_v2, %v431_v12  ;;  %v363_v7 = vadd.f32 %v362_v14, %v361_v53  ;;  %v373_v29 = vadd.f32 %v372_v15, %v371_v54  ;;  %v438_v63 = vsel %vm66_vm0, %v406_v16, 0.0  ;;  %v632_v53 = vpop.eup %631 }
 0x1d3   :  { %v382_v34 = vrot.slane %v626_v30, 4  ;;  %v408_v35 = vmul.f32 %v626_v30, %v793_v11  ;;  %v297_v36 = vsub.f32 -inf, %v289_v0  ;;  %633 = vpow2.f32 %v336_v24 }
 0x1d4   :  { %v357_v8 = vadd.f32 %v356_v18, %v355_v56  ;;  %v368_v9 = vrot.slane %v367_v21, 1  ;;  %v379_v37 = vadd.f32 %v378_v22, %v377_v59  ;;  %v445_v31 = vsel %vm66_vm0, %v407_v23, 0.0 }
 0x1d5   :  { %v394_v38 = vadd.f32 %v351_v25, %v852_v20  ;;  %v413_v39 = vrot.slane %v412_v26, 2  ;;  %v427_v40 = vrot.slane %v426_v28, 2  ;;  %v383_v41 = vadd.f32 %v626_v30, %v382_v34 }
 0x1d6   :  { %v421_v43 = vadd.f32 %v420_v19, %v419_v57  ;;  %v396_v45 = vadd.f32 %v363_v7, %v855_v27  ;;  %v374_v46 = vrot.slane %v373_v29, 1  ;;  %v439_v47 = vrot.slane %v438_v63, 4 }
 0x1d7   :  { %v446_v48 = vrot.slane %v445_v31, 4  ;;  %v384_v11 = vrot.slane %v383_v41, 2  ;;  %v452_v49 = vsel %vm66_vm0, %v408_v35, 0.0  ;;  %v312_v50 = vmul.f32 1.442695, %v297_v36 }
 0x1d8   :  { %v395_v51 = vadd.f32 %v357_v8, %v843_v44  ;;  %v369_v12 = vadd.f32 %v368_v9, %v367_v21  ;;  %v434_v52 = vrot.slane %v433_v32, 2  ;;  %v380_v5 = vrot.slane %v379_v37, 1 }
 0x1d9   :  { %v414_v10 = vadd.f32 %v413_v39, %v412_v26  ;;  %635 = vrcp.f32 %v394_v38  ;;  %v428_v54 = vadd.f32 %v427_v40, %v426_v28  ;;  %v385_v55 = vadd.f32 %v384_v11, %v383_v41 }
 0x1da   :  { %v422_v56 = vrot.slane %v421_v43, 1  ;;  %637 = vrcp.f32 %v396_v45  ;;  %v440_v57 = vadd.f32 %v439_v47, %v438_v63  ;;  %v453_v60 = vrot.slane %v452_v49, 4 }
 0x1db   :  { %v375_v61 = vadd.f32 %v374_v46, %v373_v29  ;;  %v447_v62 = vadd.f32 %v446_v48, %v445_v31  ;;  %v386_v59 = vrot.slane %v385_v55, 1  ;;  %639 = vpow2.f32 %v312_v50 }
 0x1dc   :  { %641 = vrcp.f32 %v395_v51  ;;  %v397_v0 = vadd.f32 %v369_v12, %v848_v58  ;;  %v435_v1 = vadd.f32 %v434_v52, %v433_v32  ;;  %v381_v2 = vadd.f32 %v380_v5, %v379_v37 }
 0x1dd   :  { %v634_v3 = vpop.eup %633  ;;  %v415_v4 = vrot.slane %v414_v10, 1  ;;  %v429_v6 = vrot.slane %v428_v54, 1  ;;  %v865_v14 = vmul.f32 0.0, %v628_v33  ;;  %v867_v15 = vmul.f32 0.0, %v630_v42 }
 0x1de   :  { %v441_v16 = vrot.slane %v440_v57, 2  ;;  %v454_v17 = vadd.f32 %v453_v60, %v452_v49  ;;  %v388_v18 = vrot.slane %v634_v3, 4  ;;  %v409_v19 = vmul.f32 %v634_v3, %v805_v13 }
 0x1df   :  { %v423_v21 = vadd.f32 %v422_v56, %v421_v43  ;;  %v398_v22 = vadd.f32 %v375_v61, %v865_v14  ;;  %v448_v23 = vrot.slane %v447_v62, 2  ;;  %v387_v24 = vadd.f32 %v386_v59, %v385_v55 }
 0x1e0   :  { %643 = vrcp.f32 %v397_v0  ;;  %v399_v25 = vadd.f32 %v381_v2, %v867_v15  ;;  %v389_v26 = vadd.f32 %v634_v3, %v388_v18  ;;  %v459_v28 = vsel %vm66_vm0, %v409_v19, 0.0 }
 0x1e1   :  { %v436_v30 = vrot.slane %v435_v1, 1  ;;  %v416_v32 = vadd.f32 %v415_v4, %v414_v10  ;;  %v344_v7 = vmul.f32 0.0, %v632_v53  ;;  %v460_v29 = vrot.slane %v459_v28, 4 }
 0x1e2   :  { %v430_v63 = vadd.f32 %v429_v6, %v428_v54  ;;  %v442_v33 = vadd.f32 %v441_v16, %v440_v57  ;;  %v455_v34 = vrot.slane %v454_v17, 2  ;;  %v390_v35 = vrot.slane %v389_v26, 2 }
 0x1e3   :  { %v636_v13 = vpop.eup %635  ;;  %645 = vrcp.f32 %v398_v22  ;;  %v449_v36 = vadd.f32 %v448_v23, %v447_v62  ;;  %v400_v8 = vadd.f32 %v387_v24, %v344_v7  ;;  %v461_v9 = vadd.f32 %v460_v29, %v459_v28 }
 0x1e4   :  { %v638_v37 = vpop.eup %637  ;;  %647 = vrcp.f32 %v399_v25  ;;  %v391_v31 = vadd.f32 %v390_v35, %v389_v26  ;;  %v467_v39 = vadd.f32 %v423_v21, %v843_v44  ;;  %v466_v40 = vadd.f32 %v416_v32, %v852_v20 }
 0x1e5   :  { %v640_v38 = vpop.eup %639  ;;  %v462_v41 = vrot.slane %v461_v9, 2  ;;  %v468_v43 = vadd.f32 %v430_v63, %v855_v27  ;;  %v443_v45 = vrot.slane %v442_v33, 1  ;;  %v456_v46 = vadd.f32 %v455_v34, %v454_v17 }
 0x1e6   :  { %v642_v42 = vpop.eup %641  ;;  %v392_v47 = vrot.slane %v391_v31, 1  ;;  %v437_v48 = vadd.f32 %v436_v30, %v435_v1  ;;  %v482_v11 = vmul.f32 %v636_v13, %v466_v40  ;;  %v450_v49 = vrot.slane %v449_v36, 1 }
 0x1e7   :  { %649 = vrcp.f32 %v400_v8  ;;  %v484_v50 = vmul.f32 %v638_v37, %v468_v43  ;;  %v345_v51 = vmul.f32 0.0, %v640_v38  ;;  %v483_v52 = vmul.f32 %v642_v42, %v467_v39 }
 0x1e8   :  { %v393_v12 = vadd.f32 %v392_v47, %v391_v31  ;;  %v463_v5 = vadd.f32 %v462_v41, %v461_v9  ;;  %v444_v20 = vadd.f32 %v443_v45, %v442_v33  ;;  %v457_v53 = vrot.slane %v456_v46, 1 }
 0x1e9   :  { %v469_v27 = vadd.f32 %v437_v48, %v848_v58  ;;  %v451_v54 = vadd.f32 %v450_v49, %v449_v36  ;;  %v499_v55 = vsel %vm498_vm1, %v483_v52, %v482_v11 }
 0x1ea   :  { %v644_v44 = vpop.eup %643  ;;  %v401_v10 = vadd.f32 %v393_v12, %v345_v51  ;;  %v501_v56 = vsel %vm500_vm2, %v484_v50, %v499_v55  ;;  %v464_v61 = vrot.slane %v463_v5, 1  ;;  %v470_v59 = vadd.f32 %v444_v20, %v865_v14 }
 0x1eb   :  { %v485_v60 = vmul.f32 %v644_v44, %v469_v27  ;;  %v458_v0 = vadd.f32 %v457_v53, %v456_v46  ;;  %v471_v1 = vadd.f32 %v451_v54, %v867_v15 }
 0x1ec   :  { %651 = vrcp.f32 %v401_v10  ;;  %v465_v6 = vadd.f32 %v464_v61, %v463_v5 }
 0x1ed   :  { %v646_v57 = vpop.eup %645  ;;  %v503_v2 = vsel %vm502_vm3, %v485_v60, %v501_v56  ;;  %v472_v16 = vadd.f32 %v458_v0, %v344_v7 }
 0x1ee   :  { %v648_v62 = vpop.eup %647  ;;  %v486_v3 = vmul.f32 %v646_v57, %v470_v59  ;;  %v473_v19 = vadd.f32 %v465_v6, %v345_v51 }
 0x1ef   :  { %v487_v58 = vmul.f32 %v648_v62, %v471_v1 }
 0x1f0   :  { %v505_v17 = vsel %vm504_vm4, %v486_v3, %v503_v2 }
 0x1f1   :  { %v650_v4 = vpop.eup %649  ;;  %v507_v21 = vsel %vm506_vm5, %v487_v58, %v505_v17 }
 0x1f2   :  { %v488_v18 = vmul.f32 %v650_v4, %v472_v16 }
 0x1f4   :  { %v509_v23 = vsel %vm508_vm6, %v488_v18, %v507_v21 }
 0x1f6   :  { %v652_v22 = vpop.eup %651 }
 0x1f7   :  { %v489_v14 = vmul.f32 %v652_v22, %v473_v19 }
 0x1f9   :  { %v511_v15 = vsel %vm510_vm7, %v489_v14, %v509_v23 }
 0x1fa   :  { %513 = vst.msk [vmem:[#allocation7] sm:$0xff] %vm66_vm0, %v511_v15 }
 0x1fb   :  { %708 = shalt.err (!%p705_p6)
}
 0x1fc   :  { %s709_s20 = scalar_lea.hbm %s896_s4, 128 }
 0x1fd   :  { %p710_p7 = scmp.ne.s32.totalorder %s896_s4, %s709_s20  ;;  %p713_p8 = scmp.lt.u32.totalorder %s709_s20, %s896_s4 }
 0x1ff   :  { %p715_p9 = pnand %p713_p8, %p710_p7 }
 0x201   :  { %718 = shalt.err (!%p715_p9)
}
 0x202   :  { %523 = dma.vmem_to_hbm [thread:$0]  %s521_s16, 128, %s896_s4, [#allocation4]  }
 0x203   :  { %723 = dma.done.wait [#allocation4], 128  }
 0x204   :  { %724 = vsyncadd [#allocation4], 4294967168 }
 0x205   :  { %527 = vsyncpa [#allocation3], 1 }
 0x206   :  { %528 = vsyncpa [#allocation6], 1 }
 0x207   :  { %529 = vsyncpa [#allocation4], 1 }

</bundles_post_ra>
